<compile_context>
chip_gen: v6e
topology: v6e:2x2x1
jax: 0.10.0
libtpu: 0.0.40
codegen_flags: <defaults>
</compile_context>

<pallas_src>
import math

import jax
import jax.numpy as jnp
from jax.experimental import pallas as pl
from jax.experimental.pallas import tpu as pltpu


def make_position_encoding_table(n_filters: int = 128, max_len: int = 500) -> jnp.ndarray:
    """Build the (max_len, n_filters) sinusoidal table (matches the PyTorch __init__)."""
    position = jnp.arange(0, max_len, dtype=jnp.float32)[:, None]            # (max_len, 1)
    div_term = jnp.exp(
        jnp.arange(0, n_filters, 2, dtype=jnp.float32) * -(math.log(10000.0) / n_filters)
    )                                                                        # (D//2,)
    angles = position * div_term                                             # (max_len, D//2)
    # Interleave: even columns = sin, odd columns = cos.
    pe = jnp.stack([jnp.sin(angles), jnp.cos(angles)], axis=-1)              # (max_len, D//2, 2)
    return pe.reshape(max_len, n_filters)                                    # (max_len, D)


def _pos_enc_kernel(x_ref, pe_ref, o_ref):
    # x_ref / o_ref: (Bb, Ct) lane-dense tiles. pe_ref: (1, Ct), broadcast over the Bb rows.
    o_ref[...] = (x_ref[...] + pe_ref[...]).astype(o_ref.dtype)


def _choose_tiles(n_rows: int, n_cols: int, itemsize: int,
                  target_block_bytes: int = 2 * 1024 * 1024):
    """Pick (row_tile, col_tile): lane/sublane aligned tiles that move roughly
    target_block_bytes per grid step (mem-bound op: bigger tiles win)."""
    # Lane (last-dim) tile: largest multiple of 128 that divides n_cols within the budget.
    if n_cols % 128 == 0:
        ct = 128
        max_ct = max(128, target_block_bytes // itemsize)
        d = 128
        while d <= n_cols and d <= max_ct:
            if n_cols % d == 0:
                ct = d
            d += 128
    else:
        # Last dim not 128-alignable without padding: full extent is always legal.
        ct = n_cols

    # Sublane (second-to-last) tile alignment depends on dtype packing.
    row_align = 8 if itemsize >= 4 else (16 if itemsize == 2 else 32)
    rows_budget = max(1, target_block_bytes // (ct * itemsize))
    if rows_budget >= n_rows:
        bb = n_rows                       # full extent: always legal, single row tile
    else:
        # Prefer an aligned divisor of n_rows; otherwise fall back to an aligned,
        # non-dividing tile (Pallas masks the ragged last block).
        bb = None
        cap = (rows_budget // row_align) * row_align
        for d in range(cap, 0, -row_align):
            if n_rows % d == 0:
                bb = d
                break
        if bb is None:
            bb = max(row_align, cap)
    return bb, ct


@jax.jit
def position_encoding_forward(x: jnp.ndarray, pe: jnp.ndarray) -> jnp.ndarray:
    """x: (*, L, D) -> (*, L, D): x + pe[:L] broadcast over all leading dims."""
    orig_shape = x.shape
    L, D = orig_shape[-2], orig_shape[-1]
    max_len, d_model = pe.shape
    if L > max_len:
        raise ValueError(f"sequence length {L} exceeds positional table max_len={max_len}")
    if D != d_model:
        raise ValueError(f"hidden size {D} does not match positional table width {d_model}")

    # Flatten to a lane-dense 2-D problem (exact for an elementwise add):
    #   rows = product of all leading (broadcast) dims, cols = L * D.
    n_rows = 1
    for s in orig_shape[:-2]:
        n_rows *= s
    n_rows = max(n_rows, 1)
    n_cols = L * D
    x2 = x.reshape(n_rows, n_cols)
    pe2 = pe[:L, :].astype(x.dtype).reshape(1, n_cols)

    itemsize = jnp.dtype(x.dtype).itemsize
    bb, ct = _choose_tiles(n_rows, n_cols, itemsize)
    n_row_tiles = pl.cdiv(n_rows, bb)
    n_col_tiles = pl.cdiv(n_cols, ct)

    # VMEM need: double-buffered x/out blocks + double-buffered (tiny) pe row tile.
    block_bytes = bb * ct * itemsize
    vmem_needed = 2 * (2 * block_bytes) + 2 * ct * itemsize
    # Above v5e's 16 MiB scoped default; well under v7x's 64 MiB physical VMEM.
    vmem_limit = int(min(max(2 * vmem_needed, 32 * 1024 * 1024), 48 * 1024 * 1024))

    out2 = pl.pallas_call(
        _pos_enc_kernel,
        out_shape=jax.ShapeDtypeStruct((n_rows, n_cols), x.dtype),
        grid_spec=pltpu.PrefetchScalarGridSpec(
            num_scalar_prefetch=0,
            # Column tiles outermost: pe's block index depends only on the column tile,
            # so it is fetched once per column tile (not once per grid step).
            grid=(n_col_tiles, n_row_tiles),
            in_specs=[
                pl.BlockSpec((bb, ct), lambda c, r: (r, c)),   # x tile
                pl.BlockSpec((1, ct), lambda c, r: (0, c)),    # pe tile (tracks columns only)
            ],
            out_specs=pl.BlockSpec((bb, ct), lambda c, r: (r, c)),
        ),
        compiler_params=pltpu.CompilerParams(
            dimension_semantics=("parallel", "parallel"),
            vmem_limit_bytes=vmem_limit,
        ),
    )(x2, pe2)

    return out2.reshape(orig_shape)


if __name__ == "__main__":
    key = jax.random.PRNGKey(0)
    B, L, D = 2, 8, 32          # small shapes: batch=2, seq=8, hidden=32
    max_len = 500

    pe = make_position_encoding_table(n_filters=D, max_len=max_len)

    # 3-D case (B, L, D), like the typical transformer input.
    x = jax.random.normal(key, (B, L, D), dtype=jnp.float32)
    out = jax.block_until_ready(position_encoding_forward(x, pe))
    ref = x + pe[:L, :][None, :, :]
    assert out.shape == x.shape
    assert jnp.allclose(out, ref, atol=1e-6), "mismatch vs reference (3-D)"

    # 4-D case with extra leading dims, like the PyTorch docstring example.
    x4 = jax.random.normal(jax.random.PRNGKey(1), (2, 3, L, D), dtype=jnp.float32)
    out4 = jax.block_until_ready(position_encoding_forward(x4, pe))
    ref4 = x4 + pe[:L, :][None, None, :, :]
    assert out4.shape == x4.shape
    assert jnp.allclose(out4, ref4, atol=1e-6), "mismatch vs reference (4-D)"

    print("KERNEL_OK")
</pallas_src>

<mosaic_0001>
module attributes {stable_mosaic.version = 11 : i64} {
  func.func @_pos_enc_kernel(%arg0: i32, %arg1: i32, %arg2: memref<2x256xf32, #tpu.memory_space<vmem>>, %arg3: memref<1x256xf32, #tpu.memory_space<vmem>>, %arg4: memref<2x256xf32, #tpu.memory_space<vmem>>) attributes {dimension_semantics = [#tpu.dimension_semantics<parallel>, #tpu.dimension_semantics<parallel>], iteration_bounds = array<i64: 1, 1>, scalar_prefetch = 0 : i64, scratch_operands = 0 : i64, tpu.core_type = #tpu.core_type<tc>, window_params = [{transform_indices = @transform_0, window_bounds = array<i64: 2, 256>}, {transform_indices = @transform_1, window_bounds = array<i64: 1, 256>}, {transform_indices = @transform_2, window_bounds = array<i64: 2, 256>}]} {
    %c0 = arith.constant 0 : index
    %c0_0 = arith.constant 0 : index
    %0 = vector.load %arg2[%c0, %c0_0] : memref<2x256xf32, #tpu.memory_space<vmem>>, vector<2x256xf32>
    %c0_1 = arith.constant 0 : index
    %c0_2 = arith.constant 0 : index
    %1 = vector.load %arg3[%c0_1, %c0_2] : memref<1x256xf32, #tpu.memory_space<vmem>>, vector<1x256xf32>
    %2 = vector.broadcast %1 : vector<1x256xf32> to vector<2x256xf32>
    %3 = arith.addf %0, %2 : vector<2x256xf32>
    %c0_3 = arith.constant 0 : index
    %c0_4 = arith.constant 0 : index
    %4 = vector.load %arg4[%c0_3, %c0_4] : memref<2x256xf32, #tpu.memory_space<vmem>>, vector<2x256xf32>
    tpu.vector_store %arg4[%c0_3, %c0_4], %3 {strides = array<i32>} : memref<2x256xf32, #tpu.memory_space<vmem>>, vector<2x256xf32>,
    return
  }
  func.func @transform_0(%arg0: i32, %arg1: i32) -> (i32, i32) {
    %c0_i32 = arith.constant 0 : i32
    return %arg1, %arg0 : i32, i32
  }
  func.func @transform_1(%arg0: i32, %arg1: i32) -> (i32, i32) {
    %c0_i32 = arith.constant 0 : i32
    %c0_i32_0 = arith.constant 0 : i32
    return %c0_i32, %arg0 : i32, i32
  }
  func.func @transform_2(%arg0: i32, %arg1: i32) -> (i32, i32) {
    %c0_i32 = arith.constant 0 : i32
    return %arg1, %arg0 : i32, i32
  }
}

</mosaic_0001>

<bundles_post_ra>
// kernel: position_encoding_forward.1
= control target key start
LH: loop header
LB: loop body
LE: loop exit
PB: predicated region body
PF: predicated region fallthrough
CT: control target
= control target key end

     0   :  { %v14_v0 = vlaneseq  ;;  %v38_v1 = vmov 1983009808   ;;  %s63_s1 = inlined_call_operand.vmem [shape: f32[1,256], index: 1, kind: input, shape index: {}]   ;;  %s64_s0 = inlined_call_operand.vmem [shape: f32[2,256], index: 0, kind: input, shape index: {}]   ;;  %s65_s2 = inlined_call_operand.vmem [shape: f32[2,256], index: 2, kind: output, shape index: {}]  }
   0x1   :  { %v24_v2 = vunpack.c.l.s4 %v38_v1  ;;  %v12_v4 = vld [vmem:[%s63_s1] sm:$0x3] }
   0x2   :  { %v15_v3 = vshrl.u32 %v14_v0, 7  ;;  %v11_v12 = vld [vmem:[%s64_s0] sm:$0xf] }
   0x3   :  { %v25_v5 = vunpack.c.0.s8 %v24_v2 }
   0x4   :  { %v16_v6 = vsub.s32 0, %v15_v3  ;;  %v20_v7 = vsub.s32 1, %v15_v3 }
   0x5   :  { %v28_v10 = vsub.s32 %v25_v5, %v15_v3 }
   0x6   :  { %v17_v8 = vrot.slane %v12_v4, %v16_v6  ;;  %v21_v9 = vrot.slane %v12_v4, %v20_v7 }
   0x8   :  { %v22_v11 = vcombine.low %v17_v8, %v21_v9 }
   0xa   :  { %v29_v13 = vrot.slane %v22_v11, %v28_v10 }
   0xc   :  { %v31_v14 = vadd.f32 %v29_v13, %v11_v12 }
   0xe   :  { %32 = vst [vmem:[%s65_s2] sm:$0xf] %v31_v14 }

</bundles_post_ra>
